<compile_context>
chip_gen: v7x
topology: tpu7x:2x2x1
jax: 0.10.0
libtpu: 0.0.40
codegen_flags: <defaults>
</compile_context>

<pallas_src>
import functools

import jax
import jax.numpy as jnp
from jax.experimental import pallas as pl
from jax.experimental.pallas import tpu as pltpu


def _se_kernel(x_ref, w1_ref, b1_ref, w2_ref, b2_ref, o_ref, *, inv_s):
    """One grid step processes a (Bt, C, S) tile of the input."""
    x = x_ref[...]                                   # (Bt, C, S)
    xf = x.astype(jnp.float32)

    # ---- Squeeze: global average pool (lane reduction, f32 accumulation). ----
    y = jnp.sum(xf, axis=2) * inv_s                  # (Bt, C)

    # ---- Excitation: FC -> ReLU -> FC -> sigmoid, entirely on VPU/XLU. ----
    # The FC matrices are tiny (C x C/r); broadcast-multiply + sublane
    # reductions avoid MXU push/pop latency on this mem-bound kernel.
    w1 = w1_ref[...]                                 # (C, H)
    w2 = w2_ref[...]                                 # (H, C)
    h = jnp.sum(y[:, :, None] * w1[None, :, :], axis=1) + b1_ref[...]   # (Bt, H)
    h = jnp.maximum(h, 0.0)
    s = jnp.sum(h[:, :, None] * w2[None, :, :], axis=1) + b2_ref[...]   # (Bt, C)
    s = jax.nn.sigmoid(s)                            # gate math kept in f32

    # ---- Scale: per-(batch, channel) gate broadcast along the lane axis, ----
    # fused straight into the single output store.
    o_ref[...] = (xf * s[:, :, None]).astype(o_ref.dtype)


def _pick_batch_tile(b, bytes_per_batch, target_block_bytes=8 << 20,
                     min_block_bytes=1 << 20, min_steps=4):
    """Largest batch tile whose x-block fits the target; prefer >= min_steps
    grid steps (pipelining / megacore) as long as blocks stay >= ~1 MiB."""
    divisors = [d for d in range(1, b + 1) if b % d == 0]
    fitting = [d for d in divisors if d * bytes_per_batch <= target_block_bytes]
    bt = max(fitting) if fitting else 1
    for d in reversed(divisors):
        if d <= bt and b // d >= min_steps and d * bytes_per_batch >= min_block_bytes:
            bt = d
            break
    return bt


def se_layer(x, w1, b1, w2, b2):
    """SELayer forward. x: (b, c, d, h, w). Returns the same shape/dtype."""
    b, c, d, h, w = x.shape
    s_true = d * h * w
    hidden = w1.shape[1]
    itemsize = jnp.dtype(x.dtype).itemsize

    # Flatten spatial dims onto the lane axis (free, contiguous reshape).  The
    # block uses the full (c, s_true) extents for the trailing dims, so no
    # padding pass is needed; any tail store masking is far cheaper than two
    # extra HBM sweeps from jnp.pad / slicing in the wrapper.
    x_flat = x.reshape(b, c, s_true)

    # Batch several batch elements per grid step to amortize per-step overhead.
    bytes_per_batch = c * s_true * itemsize
    bt = _pick_batch_tile(b, bytes_per_batch)
    # TODO(synk): if one batch element exceeds the VMEM block budget (very large
    # d*h*w, esp. on v7x's 64 MiB VMEM), switch to a two-phase
    # reduce-then-scale kernel that tiles S with an "arbitrary" grid axis.

    b1_2d = b1.reshape(1, hidden)
    b2_2d = b2.reshape(1, c)

    block_bytes = bt * bytes_per_batch
    weight_bytes = (c * hidden * 2 + hidden + c) * 4
    # in + out blocks, double buffered, plus weights and headroom.
    vmem_bytes = 4 * block_bytes + 4 * weight_bytes + (2 << 20)
    vmem_bytes = int(min(max(vmem_bytes, 16 << 20), 64 << 20))

    cost = pl.CostEstimate(
        flops=2 * b * c * s_true + 4 * b * c * hidden,
        transcendentals=b * c,
        bytes_accessed=2 * b * c * s_true * itemsize + 2 * weight_bytes,
    )

    kernel = functools.partial(_se_kernel, inv_s=1.0 / float(s_true))

    out = pl.pallas_call(
        kernel,
        out_shape=jax.ShapeDtypeStruct((b, c, s_true), x.dtype),
        grid_spec=pltpu.PrefetchScalarGridSpec(
            num_scalar_prefetch=0,
            grid=(b // bt,),
            in_specs=[
                pl.BlockSpec((bt, c, s_true), lambda i: (i, 0, 0)),   # x tile
                pl.BlockSpec((c, hidden), lambda i: (0, 0)),          # w1 (full)
                pl.BlockSpec((1, hidden), lambda i: (0, 0)),          # b1 (full)
                pl.BlockSpec((hidden, c), lambda i: (0, 0)),          # w2 (full)
                pl.BlockSpec((1, c), lambda i: (0, 0)),               # b2 (full)
            ],
            out_specs=pl.BlockSpec((bt, c, s_true), lambda i: (i, 0, 0)),
        ),
        compiler_params=pltpu.CompilerParams(
            dimension_semantics=("parallel",),
            vmem_limit_bytes=vmem_bytes,
        ),
        cost_estimate=cost,
    )(x_flat, w1, b1_2d, w2, b2_2d)

    return out.reshape(b, c, d, h, w)


def se_layer_ref(x, w1, b1, w2, b2):
    """Pure-JAX reference mirroring the PyTorch forward."""
    b, c = x.shape[:2]
    y = jnp.mean(x, axis=(2, 3, 4))                          # (b, c)
    y = jnp.maximum(y @ w1 + b1, 0.0)                        # (b, hidden)
    y = jax.nn.sigmoid(y @ w2 + b2)                          # (b, c)
    return x * y.reshape(b, c, 1, 1, 1)


if __name__ == "__main__":
    # Module config: channel=32, reduction=4 -> hidden=8.
    B, C, D, H, W = 2, 32, 4, 8, 8
    reduction = 4
    hidden = C // reduction

    key = jax.random.PRNGKey(0)
    kx, k1, k2, k3, k4 = jax.random.split(key, 5)

    x = jax.random.normal(kx, (B, C, D, H, W), dtype=jnp.float32)
    # Params follow nn.Linear(C, C//r), nn.Linear(C//r, C), stored transposed
    # relative to PyTorch (in_features, out_features) so `y @ w` works.
    w1 = jax.random.normal(k1, (C, hidden), dtype=jnp.float32) * 0.1
    b1 = jax.random.normal(k2, (hidden,), dtype=jnp.float32) * 0.1
    w2 = jax.random.normal(k3, (hidden, C), dtype=jnp.float32) * 0.1
    b2 = jax.random.normal(k4, (C,), dtype=jnp.float32) * 0.1

    out = se_layer(x, w1, b1, w2, b2)
    out = jax.block_until_ready(out)

    ref = se_layer_ref(x, w1, b1, w2, b2)
    assert out.shape == (B, C, D, H, W)
    assert jnp.allclose(out, ref, atol=1e-5, rtol=1e-5), "mismatch vs reference"

    print("KERNEL_OK")
</pallas_src>

<mosaic_0001>
module attributes {stable_mosaic.version = 11 : i64} {
  func.func @_se_kernel(%arg0: i32, %arg1: memref<2x32x256xf32, #tpu.memory_space<vmem>>, %arg2: memref<32x8xf32, #tpu.memory_space<vmem>>, %arg3: memref<1x8xf32, #tpu.memory_space<vmem>>, %arg4: memref<8x32xf32, #tpu.memory_space<vmem>>, %arg5: memref<1x32xf32, #tpu.memory_space<vmem>>, %arg6: memref<2x32x256xf32, #tpu.memory_space<vmem>>) attributes {dimension_semantics = [#tpu.dimension_semantics<parallel>], iteration_bounds = array<i64: 1>, scalar_prefetch = 0 : i64, scratch_operands = 0 : i64, tpu.core_type = #tpu.core_type<tc>, window_params = [{transform_indices = @transform_0, window_bounds = array<i64: 2, 32, 256>}, {pipeline_mode = #tpu.pipeline_mode<synchronous>, transform_indices = @transform_1, window_bounds = array<i64: 32, 8>}, {pipeline_mode = #tpu.pipeline_mode<synchronous>, transform_indices = @transform_2, window_bounds = array<i64: 1, 8>}, {pipeline_mode = #tpu.pipeline_mode<synchronous>, transform_indices = @transform_3, window_bounds = array<i64: 8, 32>}, {pipeline_mode = #tpu.pipeline_mode<synchronous>, transform_indices = @transform_4, window_bounds = array<i64: 1, 32>}, {transform_indices = @transform_5, window_bounds = array<i64: 2, 32, 256>}]} {
    %c0 = arith.constant 0 : index
    %c0_0 = arith.constant 0 : index
    %c0_1 = arith.constant 0 : index
    %0 = vector.load %arg1[%c0, %c0_0, %c0_1] : memref<2x32x256xf32, #tpu.memory_space<vmem>>, vector<2x32x256xf32>
    %cst = arith.constant dense<0.000000e+00> : vector<2x32xf32>
    %1 = vector.multi_reduction <add>, %0, %cst [2] : vector<2x32x256xf32> to vector<2x32xf32>
    %cst_2 = arith.constant 3.906250e-03 : f32
    %2 = vector.broadcast %cst_2 : f32 to vector<2x32xf32>
    %3 = arith.mulf %1, %2 : vector<2x32xf32>
    %c0_3 = arith.constant 0 : index
    %c0_4 = arith.constant 0 : index
    %4 = vector.load %arg2[%c0_3, %c0_4] : memref<32x8xf32, #tpu.memory_space<vmem>>, vector<32x8xf32>
    %c0_5 = arith.constant 0 : index
    %c0_6 = arith.constant 0 : index
    %5 = vector.load %arg4[%c0_5, %c0_6] : memref<8x32xf32, #tpu.memory_space<vmem>>, vector<8x32xf32>
    %6 = vector.shape_cast %3 : vector<2x32xf32> to vector<2x32x1xf32>
    %7 = vector.shape_cast %4 : vector<32x8xf32> to vector<1x32x8xf32>
    %8 = vector.broadcast %6 : vector<2x32x1xf32> to vector<2x32x8xf32>
    %9 = vector.broadcast %7 : vector<1x32x8xf32> to vector<2x32x8xf32>
    %10 = arith.mulf %8, %9 : vector<2x32x8xf32>
    %cst_7 = arith.constant dense<0.000000e+00> : vector<2x8xf32>
    %11 = vector.multi_reduction <add>, %10, %cst_7 [1] : vector<2x32x8xf32> to vector<2x8xf32>
    %c0_8 = arith.constant 0 : index
    %c0_9 = arith.constant 0 : index
    %12 = vector.load %arg3[%c0_8, %c0_9] : memref<1x8xf32, #tpu.memory_space<vmem>>, vector<1x8xf32>
    %13 = vector.broadcast %12 : vector<1x8xf32> to vector<2x8xf32>
    %14 = arith.addf %11, %13 : vector<2x8xf32>
    %cst_10 = arith.constant 0.000000e+00 : f32
    %15 = vector.broadcast %cst_10 : f32 to vector<2x8xf32>
    %16 = arith.maximumf %14, %15 : vector<2x8xf32>
    %17 = vector.shape_cast %16 : vector<2x8xf32> to vector<2x8x1xf32>
    %18 = vector.shape_cast %5 : vector<8x32xf32> to vector<1x8x32xf32>
    %19 = vector.broadcast %17 : vector<2x8x1xf32> to vector<2x8x32xf32>
    %20 = vector.broadcast %18 : vector<1x8x32xf32> to vector<2x8x32xf32>
    %21 = arith.mulf %19, %20 : vector<2x8x32xf32>
    %cst_11 = arith.constant dense<0.000000e+00> : vector<2x32xf32>
    %22 = vector.multi_reduction <add>, %21, %cst_11 [1] : vector<2x8x32xf32> to vector<2x32xf32>
    %c0_12 = arith.constant 0 : index
    %c0_13 = arith.constant 0 : index
    %23 = vector.load %arg5[%c0_12, %c0_13] : memref<1x32xf32, #tpu.memory_space<vmem>>, vector<1x32xf32>
    %24 = vector.broadcast %23 : vector<1x32xf32> to vector<2x32xf32>
    %25 = arith.addf %22, %24 : vector<2x32xf32>
    %26 = arith.negf %25 : vector<2x32xf32>
    %27 = math.exp %26 : vector<2x32xf32>
    %cst_14 = arith.constant 1.000000e+00 : f32
    %28 = vector.broadcast %cst_14 : f32 to vector<2x32xf32>
    %29 = arith.addf %28, %27 : vector<2x32xf32>
    %30 = arith.divf %28, %29 : vector<2x32xf32>
    %31 = vector.shape_cast %30 : vector<2x32xf32> to vector<2x32x1xf32>
    %32 = vector.broadcast %31 : vector<2x32x1xf32> to vector<2x32x256xf32>
    %33 = arith.mulf %0, %32 : vector<2x32x256xf32>
    %c0_15 = arith.constant 0 : index
    %c0_16 = arith.constant 0 : index
    %c0_17 = arith.constant 0 : index
    %34 = vector.load %arg6[%c0_15, %c0_16, %c0_17] : memref<2x32x256xf32, #tpu.memory_space<vmem>>, vector<2x32x256xf32>
    tpu.vector_store %arg6[%c0_15, %c0_16, %c0_17], %33 {strides = array<i32>} : memref<2x32x256xf32, #tpu.memory_space<vmem>>, vector<2x32x256xf32>,
    return
  }
  func.func @transform_0(%arg0: i32) -> (i32, i32, i32) {
    %c0_i32 = arith.constant 0 : i32
    %c0_i32_0 = arith.constant 0 : i32
    %c0_i32_1 = arith.constant 0 : i32
    return %arg0, %c0_i32, %c0_i32_0 : i32, i32, i32
  }
  func.func @transform_1(%arg0: i32) -> (i32, i32) {
    %c0_i32 = arith.constant 0 : i32
    %c0_i32_0 = arith.constant 0 : i32
    %c0_i32_1 = arith.constant 0 : i32
    return %c0_i32, %c0_i32_0 : i32, i32
  }
  func.func @transform_2(%arg0: i32) -> (i32, i32) {
    %c0_i32 = arith.constant 0 : i32
    %c0_i32_0 = arith.constant 0 : i32
    %c0_i32_1 = arith.constant 0 : i32
    return %c0_i32, %c0_i32_0 : i32, i32
  }
  func.func @transform_3(%arg0: i32) -> (i32, i32) {
    %c0_i32 = arith.constant 0 : i32
    %c0_i32_0 = arith.constant 0 : i32
    %c0_i32_1 = arith.constant 0 : i32
    return %c0_i32, %c0_i32_0 : i32, i32
  }
  func.func @transform_4(%arg0: i32) -> (i32, i32) {
    %c0_i32 = arith.constant 0 : i32
    %c0_i32_0 = arith.constant 0 : i32
    %c0_i32_1 = arith.constant 0 : i32
    return %c0_i32, %c0_i32_0 : i32, i32
  }
  func.func @transform_5(%arg0: i32) -> (i32, i32, i32) {
    %c0_i32 = arith.constant 0 : i32
    %c0_i32_0 = arith.constant 0 : i32
    %c0_i32_1 = arith.constant 0 : i32
    return %arg0, %c0_i32, %c0_i32_0 : i32, i32, i32
  }
}

</mosaic_0001>

<bundles_post_ra>
// kernel: tpu_custom_call.1
= control target key start
LH: loop header
LB: loop body
LE: loop exit
PB: predicated region body
PF: predicated region fallthrough
CT: control target
= control target key end

     0   :  { %10 = vsyncpa [#allocation3], 0  ;;  %s494_s0 = inlined_call_operand.hbm [shape: f32[2,32,256], index: 0, kind: input, shape index: {}]   ;;  %s495_s1 = inlined_call_operand.vmem [shape: f32[32,8], index: 1, kind: input, shape index: {}]   ;;  %s496_s2 = inlined_call_operand.vmem [shape: f32[1,8], index: 2, kind: input, shape index: {}]   ;;  %s497_s3 = inlined_call_operand.vmem [shape: f32[8,32], index: 3, kind: input, shape index: {}]   ;;  %s498_s4 = inlined_call_operand.vmem [shape: f32[1,32], index: 4, kind: input, shape index: {}]   ;;  %s499_s5 = inlined_call_operand.hbm [shape: f32[2,32,256], index: 5, kind: output, shape index: {}]  }
   0x1   :  { %11 = vsyncpa [#allocation4], 0  ;;  %s337_s18 = smov [#allocation2]   ;;  %s289_s22 = scalar_lea.hbm %s494_s0, 2048 }
   0x2   :  { %s17_s19 = sshll.u32 %s337_s18, 4  ;;  %p290_p0 = scmp.ne.s32.totalorder %s494_s0, %s289_s22  ;;  %s18_s19 = int_to_ptr.vmem [resolvable:$true] %s17_s19 }
   0x3   :  { %p293_p1 = scmp.lt.u32.totalorder %s289_s22, %s494_s0 }
   0x5   :  { %p295_p2 = pnand %p293_p1, %p290_p0 }
   0x7   :  { %298 = shalt.err (!%p295_p2)
}
   0x8   :  { %s299_s27 = scalar_lea.vmem %s18_s19, 2048  ;;  %p304_p4 = scmp.lt.s32.totalorder %s18_s19, %s18_s19 }
   0x9   :  { %p300_p3 = scmp.ne.s32.totalorder %s18_s19, %s299_s27  ;;  %p305_p5 = scmp.lt.s32.totalorder %s299_s27, %s299_s27 }
   0xb   :  { %p306_p6 = por %p305_p5, %p304_p4 }
   0xd   :  { %p307_p7 = pnand %p306_p6, %p300_p3 }
   0xf   :  { %310 = shalt.err (!%p307_p7)
}
  0x10   :  { %s338_s28 = smov 256   ;;  %s339_s29 = smov 16  }
  0x11   :  { %23 = dma.hbm_to_vmem [thread:$0]  %s494_s0, 2048, %s18_s19, [#allocation3], %s338_s28, %s338_s28, %s339_s29  }
  0x12   :  { %333 = dma.done.wait [#allocation3], 2048  }
  0x13   :  { %334 = vsyncadd [#allocation3], 4294965248  ;;  %v386_v0 = vld [vmem:[#allocation2 + $0x40] sm:$0xff]  ;;  %v388_v1 = vld [vmem:[#allocation2 + $0x48] sm:$0xff]  ;;  %vm96_vm0 = vcmask 64512   ;;  %vm150_vm1 = vcmask 261120  }
  0x14   :  { %v390_v2 = vld [vmem:[#allocation2] sm:$0xff]  ;;  %v63_v3 = vadd.f32 %v388_v1, %v386_v0  ;;  %v394_v4 = vld [vmem:[#allocation2 + $0x8] sm:$0xff]  ;;  %v396_v5 = vld [vmem:[#allocation2 + $0x50] sm:$0xff] }
  0x15   :  { %v398_v6 = vld [vmem:[#allocation2 + $0x58] sm:$0xff]  ;;  %v51_v7 = vadd.f32 %v394_v4, %v390_v2  ;;  %v402_v8 = vld [vmem:[#allocation2 + $0x10] sm:$0xff]  ;;  %v410_v12 = vld [vmem:[#allocation2 + $0x60] sm:$0xff] }
  0x16   :  { %v404_v9 = vld [vmem:[#allocation2 + $0x18] sm:$0xff]  ;;  %64 = vadd.xlane.f32.xlu1 %v63_v3  ;;  %v66_v10 = vadd.f32 %v398_v6, %v396_v5  ;;  %v412_v13 = vld [vmem:[#allocation2 + $0x68] sm:$0xff]  ;;  %v414_v14 = vld [vmem:[#allocation2 + $0x20] sm:$0xff] }
  0x17   :  { %52 = vadd.xlane.f32.xlu0 %v51_v7  ;;  %v54_v11 = vadd.f32 %v404_v9, %v402_v8  ;;  %v416_v15 = vld [vmem:[#allocation2 + $0x28] sm:$0xff]  ;;  %v69_v16 = vadd.f32 %v412_v13, %v410_v12  ;;  %v422_v18 = vld [vmem:[#allocation2 + $0x70] sm:$0xff]  ;;  %v424_v19 = vld [vmem:[#allocation2 + $0x78] sm:$0xff] }
  0x18   :  { %v57_v17 = vadd.f32 %v416_v15, %v414_v14  ;;  %v426_v20 = vld [vmem:[#allocation2 + $0x30] sm:$0xff]  ;;  %v428_v21 = vld [vmem:[#allocation2 + $0x38] sm:$0xff]  ;;  %v72_v22 = vadd.f32 %v424_v19, %v422_v18  ;;  %v83_v27 = vld [vmem:[%s495_s1] sm:$0xff] }
  0x19   :  { %v60_v23 = vadd.f32 %v428_v21, %v426_v20  ;;  %v84_v30 = vld [vmem:[%s495_s1 + $0x8] sm:$0xff]  ;;  %v85_v40 = vld [vmem:[%s495_s1 + $0x10] sm:$0xff]  ;;  %v86_v49 = vld [vmem:[%s495_s1 + $0x18] sm:$0xff] }
  0x1a   :  { %67 = vadd.xlane.f32.xlu1 %v66_v10 }
  0x1b   :  { %55 = vadd.xlane.f32.xlu0 %v54_v11 }
  0x1e   :  { %70 = vadd.xlane.f32.xlu1 %v69_v16 }
  0x1f   :  { %58 = vadd.xlane.f32.xlu0 %v57_v17 }
  0x22   :  { %73 = vadd.xlane.f32.xlu1 %v72_v22 }
  0x23   :  { %61 = vadd.xlane.f32.xlu0 %v60_v23  ;;  %v134_v23 = vlaneseq }
  0xa3   :  { %v65_v24 = vpop.xlane.xlu1 %64 }
  0xa4   :  { %v79_v25 = vmul.f32 0.00390625, %v65_v24  ;;  %v53_v26 = vpop.xlane.xlu0 %52 }
  0xa5   :  { %v75_v33 = vmul.f32 0.00390625, %v53_v26 }
  0xa6   :  { %v92_v28 = vmul.f32 %v83_v27, %v79_v25 }
  0xa7   :  { %v68_v29 = vpop.xlane.xlu1 %67  ;;  %v88_v43 = vmul.f32 %v83_v27, %v75_v33 }
  0xa8   :  { %v80_v31 = vmul.f32 0.00390625, %v68_v29  ;;  %v56_v32 = vpop.xlane.xlu0 %55  ;;  %v110_v35 = vsel %vm96_vm0, %v92_v28, 0.0  ;;  %v135_v28 = vshrl.u32 %v134_v23, 7  ;;  %v273_v29 = vld [vmem:[%s496_s2] ss:$0 sm:$0xff] }
  0xa9   :  { %v76_v34 = vmul.f32 0.00390625, %v56_v32  ;;  %v97_v54 = vsel %vm96_vm0, %v88_v43, 0.0 }
  0xaa   :  { %v93_v36 = vmul.f32 %v84_v30, %v80_v31 }
  0xab   :  { %v89_v37 = vmul.f32 %v84_v30, %v76_v34  ;;  %v71_v38 = vpop.xlane.xlu1 %70  ;;  %v136_v34 = vsub.s32 0, %v135_v28 }
  0xac   :  { %v111_v39 = vsel %vm96_vm0, %v93_v36, 0.0  ;;  %v81_v41 = vmul.f32 0.00390625, %v71_v38  ;;  %v59_v42 = vpop.xlane.xlu0 %58 }
  0xad   :  { %v112_v44 = vadd.f32 %v111_v39, %v110_v35  ;;  %v77_v45 = vmul.f32 0.00390625, %v59_v42  ;;  %v98_v47 = vsel %vm96_vm0, %v89_v37, 0.0 }
  0xae   :  { %v94_v46 = vmul.f32 %v85_v40, %v81_v41  ;;  %v99_v58 = vadd.f32 %v98_v47, %v97_v54 }
  0xaf   :  { %v90_v48 = vmul.f32 %v85_v40, %v77_v45  ;;  %v74_v50 = vpop.xlane.xlu1 %73  ;;  %v87_v40 = vld [vmem:[%s497_s3] sm:$0xff]  ;;  %s340_s3 = smov [#allocation5]  }
  0xb0   :  { %v113_v51 = vsel %vm96_vm0, %v94_v46, 0.0  ;;  %v82_v52 = vmul.f32 0.00390625, %v74_v50  ;;  %v62_v53 = vpop.xlane.xlu0 %61 }
  0xb1   :  { %v114_v55 = vadd.f32 %v113_v51, %v112_v44  ;;  %v100_v56 = vsel %vm96_vm0, %v90_v48, 0.0  ;;  %v78_v57 = vmul.f32 0.00390625, %v62_v53 }
  0xb2   :  { %v95_v59 = vmul.f32 %v86_v49, %v82_v52  ;;  %v101_v61 = vadd.f32 %v100_v56, %v99_v58  ;;  %v274_v56 = vld [vmem:[%s498_s4] ss:$0 sm:$0xff]  ;;  %s261_s4 = sshll.u32 %s340_s3, 4  ;;  %s262_s4 = int_to_ptr.vmem [resolvable:$true] %s261_s4 }
  0xb3   :  { %v91_v60 = vmul.f32 %v86_v49, %v78_v57  ;;  %s311_s18 = scalar_lea.vmem %s262_s4, 2048  ;;  %p316_p9 = scmp.lt.s32.totalorder %s262_s4, %s262_s4 }
  0xb4   :  { %v115_v62 = vsel %vm96_vm0, %v95_v59, 0.0  ;;  %p312_p8 = scmp.ne.s32.totalorder %s262_s4, %s311_s18  ;;  %p317_p10 = scmp.lt.s32.totalorder %s311_s18, %s311_s18 }
  0xb5   :  { %v116_v63 = vadd.f32 %v115_v62, %v114_v55  ;;  %v102_v3 = vsel %vm96_vm0, %v91_v60, 0.0 }
  0xb6   :  { %v103_v7 = vadd.f32 %v102_v3, %v101_v61  ;;  %p318_p11 = por %p317_p10, %p316_p9 }
  0xb7   :  { %v117_v10 = vrot.slane %v116_v63, 4 }
  0xb8   :  { %v104_v11 = vrot.slane %v103_v7, 4  ;;  %p319_p12 = pnand %p318_p11, %p312_p8 }
  0xb9   :  { %v118_v16 = vadd.f32 %v117_v10, %v116_v63 }
  0xba   :  { %v105_v17 = vadd.f32 %v104_v11, %v103_v7 }
  0xbb   :  { %v119_v22 = vrot.slane %v118_v16, 2 }
  0xbc   :  { %v106_v24 = vrot.slane %v105_v17, 2 }
  0xbd   :  { %v120_v25 = vadd.f32 %v119_v22, %v118_v16 }
  0xbe   :  { %v107_v26 = vadd.f32 %v106_v24, %v105_v17 }
  0xbf   :  { %v121_v27 = vrot.slane %v120_v25, 1 }
  0xc0   :  { %v108_v30 = vrot.slane %v107_v26, 1 }
  0xc1   :  { %v122_v31 = vadd.f32 %v121_v27, %v120_v25 }
  0xc2   :  { %v109_v32 = vadd.f32 %v108_v30, %v107_v26 }
  0xc3   :  { %v131_v33 = vadd.f32 %v273_v29, %v122_v31 }
  0xc4   :  { %v130_v35 = vadd.f32 %v273_v29, %v109_v32 }
  0xc5   :  { %v133_v36 = vmax.f32 %v131_v33, 0.0 }
  0xc6   :  { %v132_v37 = vmax.f32 %v130_v35, 0.0 }
  0xc7   :  { %v144_v38 = vrot.slane %v133_v36, %v136_v34 }
  0xc8   :  { %v137_v39 = vrot.slane %v132_v37, %v136_v34 }
  0xc9   :  { %146 = vbcast.lane.b32.xlu1 %v144_v38, 256 }
  0xca   :  { %139 = vbcast.lane.b32.xlu0 %v137_v39, 256 }
 0x13b   :  { %v147_v41 = vpop.permute.xlu1 %146 }
 0x13c   :  { %v149_v42 = vmul.f32 %v147_v41, %v87_v40  ;;  %v140_v43 = vpop.permute.xlu0 %139 }
 0x13d   :  { %v148_v44 = vmul.f32 %v140_v43, %v87_v40 }
 0x13e   :  { %v158_v45 = vsel %vm150_vm1, %v149_v42, 0.0 }
 0x13f   :  { %v159_v46 = vrot.slane %v158_v45, 4  ;;  %v151_v47 = vsel %vm150_vm1, %v148_v44, 0.0 }
 0x140   :  { %v152_v48 = vrot.slane %v151_v47, 4 }
 0x141   :  { %v160_v49 = vadd.f32 %v159_v46, %v158_v45 }
 0x142   :  { %v153_v50 = vadd.f32 %v152_v48, %v151_v47 }
 0x143   :  { %v161_v51 = vrot.slane %v160_v49, 2 }
 0x144   :  { %v154_v52 = vrot.slane %v153_v50, 2 }
 0x145   :  { %v162_v53 = vadd.f32 %v161_v51, %v160_v49 }
 0x146   :  { %v155_v54 = vadd.f32 %v154_v52, %v153_v50 }
 0x147   :  { %v163_v55 = vrot.slane %v162_v53, 1 }
 0x148   :  { %v156_v57 = vrot.slane %v155_v54, 1 }
 0x149   :  { %v164_v58 = vadd.f32 %v163_v55, %v162_v53 }
 0x14a   :  { %v157_v59 = vadd.f32 %v156_v57, %v155_v54 }
 0x14b   :  { %v173_v60 = vadd.f32 %v274_v56, %v164_v58 }
 0x14c   :  { %v172_v61 = vadd.f32 %v274_v56, %v157_v59 }
 0x14d   :  { %v276_v62 = vmul.f32 -1.442695, %v173_v60 }
 0x14e   :  { %v275_v63 = vmul.f32 -1.442695, %v172_v61 }
 0x14f   :  { %281 = vpow2.f32 %v276_v62 }
 0x150   :  { %283 = vpow2.f32 %v275_v63 }
 0x159   :  { %v282_v3 = vpop.eup %281 }
 0x15a   :  { %v284_v7 = vpop.eup %283  ;;  %v181_v10 = vadd.f32 1.0, %v282_v3 }
 0x15b   :  { %v180_v11 = vadd.f32 1.0, %v284_v7 }
 0x15d   :  { %285 = vrcp.f32 %v180_v11 }
 0x15e   :  { %287 = vrcp.f32 %v181_v10 }
 0x167   :  { %v286_v16 = vpop.eup %285 }
 0x168   :  { %v189_v17 = vrot.slane %v286_v16, %v136_v34  ;;  %v288_v22 = vpop.eup %287 }
 0x169   :  { %v208_v23 = vrot.slane %v288_v22, %v136_v34 }
 0x16a   :  { %199 = vbcast.lane.b32.xlu0 %v189_v17, 272  ;;  %191 = vbcast.lane.b32.xlu1 %v189_v17, 256 }
 0x16e   :  { %210 = vbcast.lane.b32.xlu0 %v208_v23, 256  ;;  %195 = vbcast.lane.b32.xlu1 %v189_v17, 264 }
 0x172   :  { %218 = vbcast.lane.b32.xlu0 %v208_v23, 272  ;;  %203 = vbcast.lane.b32.xlu1 %v189_v17, 280 }
 0x176   :  { %214 = vbcast.lane.b32.xlu1 %v208_v23, 264 }
 0x17a   :  { %222 = vbcast.lane.b32.xlu1 %v208_v23, 280 }
 0x1dc   :  { %v200_v24 = vpop.permute.xlu0 %199  ;;  %v192_v25 = vpop.permute.xlu1 %191 }
 0x1dd   :  { %v228_v26 = vmul.f32 %v200_v24, %v414_v14  ;;  %v229_v27 = vmul.f32 %v200_v24, %v416_v15  ;;  %v224_v28 = vmul.f32 %v192_v25, %v390_v2  ;;  %v225_v29 = vmul.f32 %v192_v25, %v394_v4 }
 0x1df   :  { %244 = vst [vmem:[#allocation5 + $0x20] sm:$0xff] %v228_v26  ;;  %245 = vst [vmem:[#allocation5 + $0x28] sm:$0xff] %v229_v27 }
 0x1e0   :  { %240 = vst [vmem:[#allocation5] sm:$0xff] %v224_v28  ;;  %241 = vst [vmem:[#allocation5 + $0x8] sm:$0xff] %v225_v29  ;;  %v211_v30 = vpop.permute.xlu0 %210  ;;  %v196_v31 = vpop.permute.xlu1 %195 }
 0x1e1   :  { %v232_v32 = vmul.f32 %v211_v30, %v386_v0  ;;  %v233_v33 = vmul.f32 %v211_v30, %v388_v1  ;;  %v226_v34 = vmul.f32 %v196_v31, %v402_v8  ;;  %v227_v14 = vmul.f32 %v196_v31, %v404_v9 }
 0x1e3   :  { %248 = vst [vmem:[#allocation5 + $0x40] sm:$0xff] %v232_v32  ;;  %249 = vst [vmem:[#allocation5 + $0x48] sm:$0xff] %v233_v33 }
 0x1e4   :  { %242 = vst [vmem:[#allocation5 + $0x10] sm:$0xff] %v226_v34  ;;  %243 = vst [vmem:[#allocation5 + $0x18] sm:$0xff] %v227_v14  ;;  %v219_v2 = vpop.permute.xlu0 %218  ;;  %v204_v4 = vpop.permute.xlu1 %203 }
 0x1e5   :  { %v236_v15 = vmul.f32 %v219_v2, %v410_v12  ;;  %v237_v35 = vmul.f32 %v219_v2, %v412_v13  ;;  %v230_v36 = vmul.f32 %v204_v4, %v426_v20  ;;  %v231_v0 = vmul.f32 %v204_v4, %v428_v21 }
 0x1e7   :  { %252 = vst [vmem:[#allocation5 + $0x60] sm:$0xff] %v236_v15  ;;  %253 = vst [vmem:[#allocation5 + $0x68] sm:$0xff] %v237_v35 }
 0x1e8   :  { %246 = vst [vmem:[#allocation5 + $0x30] sm:$0xff] %v230_v36  ;;  %247 = vst [vmem:[#allocation5 + $0x38] sm:$0xff] %v231_v0  ;;  %v215_v1 = vpop.permute.xlu1 %214 }
 0x1e9   :  { %v234_v8 = vmul.f32 %v215_v1, %v396_v5  ;;  %v235_v9 = vmul.f32 %v215_v1, %v398_v6 }
 0x1eb   :  { %250 = vst [vmem:[#allocation5 + $0x50] sm:$0xff] %v234_v8  ;;  %251 = vst [vmem:[#allocation5 + $0x58] sm:$0xff] %v235_v9 }
 0x1ec   :  { %v223_v12 = vpop.permute.xlu1 %222 }
 0x1ed   :  { %v238_v13 = vmul.f32 %v223_v12, %v422_v18  ;;  %v239_v20 = vmul.f32 %v223_v12, %v424_v19 }
 0x1ef   :  { %254 = vst [vmem:[#allocation5 + $0x70] sm:$0xff] %v238_v13  ;;  %255 = vst [vmem:[#allocation5 + $0x78] sm:$0xff] %v239_v20 }
 0x1f0   :  { %322 = shalt.err (!%p319_p12)
}
 0x1f1   :  { %s323_s21 = scalar_lea.hbm %s499_s5, 2048 }
 0x1f2   :  { %p324_p13 = scmp.ne.s32.totalorder %s499_s5, %s323_s21  ;;  %p327_p0 = scmp.lt.u32.totalorder %s323_s21, %s499_s5 }
 0x1f4   :  { %p329_p1 = pnand %p327_p0, %p324_p13 }
 0x1f6   :  { %332 = shalt.err (!%p329_p1)
}
 0x1f7   :  { %267 = dma.vmem_to_hbm [thread:$0]  %s262_s4, 2048, %s499_s5, [#allocation4], %s338_s28, %s338_s28, %s339_s29  }
 0x1f8   :  { %335 = dma.done.wait [#allocation4], 2048  }
 0x1f9   :  { %336 = vsyncadd [#allocation4], 4294965248 }
 0x1fa   :  { %271 = vsyncpa [#allocation3], 1 }
 0x1fb   :  { %272 = vsyncpa [#allocation4], 1 }

</bundles_post_ra>
